<compile_context>
chip_gen: v5e
topology: v5e:2x2
jax: 0.10.0
libtpu: 0.0.40
codegen_flags: <defaults>
</compile_context>

<pallas_src>
import functools

import jax
import jax.numpy as jnp
from jax import lax
from jax.experimental import pallas as pl
from jax.experimental.pallas import tpu as pltpu

_LANES = 128


# -----------------------------------------------------------------------------
# Fused kernel: RNN (tanh, zero h0) -> Linear -> ReLU -> Linear, per timestep.
#   pre      = X_tm @ W_ih^T + (b_ih + b_hh)      (hoisted, one matmul, scratch)
#   h_t      = tanh(pre[t] + h_{t-1} @ W_hh^T)    (recurrence, 1 matmul/step)
#   y_t      = relu(h_t @ W1^T + b1) @ W2p^T + b2p  (fused epilogue per step)
# Weights arrive pre-transposed: (I,H), (H,H), (H,H), (H,O_pad).
# -----------------------------------------------------------------------------
def fused_rnn_mlp_kernel(
    x_ref,        # (S*B, I)   time-major rows (t, b)
    wih_t_ref,    # (I, H)
    whh_t_ref,    # (H, H)
    bias_ref,     # (1, H)     b_ih + b_hh (pre-folded)
    w1_t_ref,     # (H, H)     hidden 'L'
    b1_ref,       # (1, H)
    w2_t_ref,     # (H, Op)    final Linear, lane-padded (Op multiple of 128)
    b2_ref,       # (1, Op)
    o_ref,        # (S*B, Op)  time-major rows (t, b), lane-dense
    pre_ref,      # VMEM scratch (S*B, H)
    *,
    batch,
    seq,
    unroll,
):
    B, S = batch, seq
    H = whh_t_ref.shape[0]

    # --- hoisted input projection: one matmul for all S*B rows, stored once ---
    pre_ref[...] = (
        jnp.dot(x_ref[...], wih_t_ref[...], preferred_element_type=jnp.float32)
        + bias_ref[...]
    )

    # Loop-invariant operands, loaded once (hoisted out of the recurrence).
    whh_t = whh_t_ref[...]
    w1_t = w1_t_ref[...]
    b1 = b1_ref[...]
    w2_t = w2_t_ref[...]
    b2 = b2_ref[...]

    def step(t, h):
        row = t * B
        pre_t = pre_ref[pl.ds(row, B), :]                            # (B, H)
        # h_t = tanh(x_t W_ih^T + b_ih + h_{t-1} W_hh^T + b_hh)
        h = jnp.tanh(
            pre_t + jnp.dot(h, whh_t, preferred_element_type=jnp.float32)
        )
        # Fused 'LR' hidden stack + final Linear for this timestep: these
        # matmuls are off the serial critical path and hide under its slack.
        hid = jnp.maximum(
            jnp.dot(h, w1_t, preferred_element_type=jnp.float32) + b1, 0.0
        )
        y_t = jnp.dot(hid, w2_t, preferred_element_type=jnp.float32) + b2
        o_ref[pl.ds(row, B), :] = y_t.astype(o_ref.dtype)            # lane-dense
        return h

    lax.fori_loop(0, S, step, jnp.zeros((B, H), jnp.float32), unroll=unroll)


def fused_forward(x, wih_t, whh_t, bias, w1_t, b1, w2_t, b2):
    """x: (B, S, I) batch-first.  Returns (B*S, O) batch-major (== .view(-1, O))."""
    B, S, I = x.shape
    H = whh_t.shape[0]
    O = w2_t.shape[1]
    O_pad = max(_LANES, ((O + _LANES - 1) // _LANES) * _LANES)

    # Wrapper-side layout plumbing (not compute hoisting):
    #   * x to time-major 2-D so each step reads a contiguous leading row block.
    #   * zero-pad the final Linear to 128 lanes -> unmasked output stores.
    x_tm = jnp.transpose(x, (1, 0, 2)).reshape(S * B, I)
    w2_t_p = jnp.pad(w2_t, ((0, 0), (0, O_pad - O)))
    b2_p = jnp.pad(b2, ((0, 0), (0, O_pad - O)))

    # Explicit VMEM budget: inputs/outputs are double-buffered even at
    # grid=(1,), plus the (S*B, H) scratch.  Floor 32 MiB, cap 64 MiB (v7x).
    est = 4 * (
        2 * x_tm.size + 2 * S * B * O_pad + S * B * H
        + wih_t.size + whh_t.size + w1_t.size + H * O_pad + 3 * H + O_pad
    )
    vmem_limit = int(min(max(2 * est, 32 << 20), 64 << 20))

    kernel = functools.partial(
        fused_rnn_mlp_kernel, batch=B, seq=S, unroll=(S <= 32)
    )

    y_tm = pl.pallas_call(
        kernel,
        out_shape=jax.ShapeDtypeStruct((S * B, O_pad), jnp.float32),
        grid_spec=pltpu.PrefetchScalarGridSpec(
            num_scalar_prefetch=0,
            grid=(1,),  # single step: the recurrence is sequential inside the body
            in_specs=[
                pl.BlockSpec((S * B, I), lambda i: (0, 0)),
                pl.BlockSpec((I, H), lambda i: (0, 0)),
                pl.BlockSpec((H, H), lambda i: (0, 0)),
                pl.BlockSpec((1, H), lambda i: (0, 0)),
                pl.BlockSpec((H, H), lambda i: (0, 0)),
                pl.BlockSpec((1, H), lambda i: (0, 0)),
                pl.BlockSpec((H, O_pad), lambda i: (0, 0)),
                pl.BlockSpec((1, O_pad), lambda i: (0, 0)),
            ],
            out_specs=pl.BlockSpec((S * B, O_pad), lambda i: (0, 0)),
            scratch_shapes=[pltpu.VMEM((S * B, H), jnp.float32)],
        ),
        compiler_params=pltpu.CompilerParams(
            dimension_semantics=("arbitrary",),
            vmem_limit_bytes=vmem_limit,
        ),
    )(x_tm, wih_t, whh_t, bias, w1_t, b1, w2_t_p, b2_p)

    # time-major (S*B, O_pad) -> batch-major (B*S, O): matches PyTorch's
    # out.contiguous().view(-1, hidden) row ordering.  Pure layout plumbing.
    y = jnp.transpose(y_tm.reshape(S, B, O_pad), (1, 0, 2)).reshape(B * S, O_pad)
    return y[:, :O]


# -----------------------------------------------------------------------------
# Full forward: MyNeuralNetwork('RNN', hiddenLayerStructure='LR')
# -----------------------------------------------------------------------------
@jax.jit
def my_neural_network_forward(x, params):
    return fused_forward(
        x,
        params["w_ih_t"], params["w_hh_t"], params["b_fused"],
        params["w1_t"], params["b1"], params["w2_t"], params["b2"],
    )


def init_params(key, input_size, hidden_size, output_size):
    """PyTorch-style U(-1/sqrt(H), 1/sqrt(H)) init.  Returns (kernel_params, raw)."""
    ks = jax.random.split(key, 8)
    bound = 1.0 / jnp.sqrt(hidden_size)

    def u(k, shape):
        return jax.random.uniform(k, shape, jnp.float32, -bound, bound)

    w_ih = u(ks[0], (hidden_size, input_size))    # nn.RNN weight_ih_l0
    w_hh = u(ks[1], (hidden_size, hidden_size))   # nn.RNN weight_hh_l0
    b_ih = u(ks[2], (hidden_size,))
    b_hh = u(ks[3], (hidden_size,))
    w1 = u(ks[4], (hidden_size, hidden_size))     # hidden 'L'
    b1 = u(ks[5], (hidden_size,))
    w2 = u(ks[6], (output_size, hidden_size))     # final Linear
    b2 = u(ks[7], (output_size,))

    kernel_params = {
        "w_ih_t": w_ih.T,                          # (I, H)
        "w_hh_t": w_hh.T,                          # (H, H)
        "b_fused": (b_ih + b_hh).reshape(1, -1),   # (1, H) folded RNN biases
        "w1_t": w1.T,                              # (H, H)
        "b1": b1.reshape(1, -1),                   # (1, H)
        "w2_t": w2.T,                              # (H, O)
        "b2": b2.reshape(1, -1),                   # (1, O)
    }
    raw = {"w_ih": w_ih, "w_hh": w_hh, "b_ih": b_ih, "b_hh": b_hh,
           "w1": w1, "b1": b1, "w2": w2, "b2": b2}
    return kernel_params, raw


def ref_forward(x, raw, hidden_size):
    """Pure-JAX reference with the original PyTorch per-step summation order."""
    B, S, _ = x.shape
    h = jnp.zeros((B, hidden_size), jnp.float32)
    outs = []
    for t in range(S):
        h = jnp.tanh(
            x[:, t] @ raw["w_ih"].T + raw["b_ih"]
            + h @ raw["w_hh"].T + raw["b_hh"]
        )
        outs.append(h)
    out = jnp.stack(outs, axis=1).reshape(-1, hidden_size)   # batch-major .view(-1, H)
    hid = jnp.maximum(out @ raw["w1"].T + raw["b1"], 0.0)
    return hid @ raw["w2"].T + raw["b2"]


if __name__ == "__main__":
    # Small shapes: batch=2, seq=8, inputSize=16, hiddenLayerSize=32, outputSize=8
    B, S, I, H, O = 2, 8, 16, 32, 8
    key = jax.random.PRNGKey(0)
    kx, kp = jax.random.split(key)
    x = jax.random.normal(kx, (B, S, I), jnp.float32)
    params, raw = init_params(kp, I, H, O)

    y = my_neural_network_forward(x, params)
    y = jax.block_until_ready(y)
    assert y.shape == (B * S, O), y.shape

    y_ref = ref_forward(x, raw, H)
    assert jnp.allclose(y, y_ref, atol=1e-5, rtol=1e-5)

    print("KERNEL_OK")
</pallas_src>

<mosaic_0001>
module attributes {stable_mosaic.version = 11 : i64} {
  func.func @fused_rnn_mlp_kernel(%arg0: i32, %arg1: memref<16x16xf32, #tpu.memory_space<vmem>>, %arg2: memref<16x32xf32, #tpu.memory_space<vmem>>, %arg3: memref<32x32xf32, #tpu.memory_space<vmem>>, %arg4: memref<1x32xf32, #tpu.memory_space<vmem>>, %arg5: memref<32x32xf32, #tpu.memory_space<vmem>>, %arg6: memref<1x32xf32, #tpu.memory_space<vmem>>, %arg7: memref<32x128xf32, #tpu.memory_space<vmem>>, %arg8: memref<1x128xf32, #tpu.memory_space<vmem>>, %arg9: memref<16x128xf32, #tpu.memory_space<vmem>>, %arg10: memref<16x32xf32, #tpu.memory_space<vmem>>) attributes {dimension_semantics = [#tpu.dimension_semantics<arbitrary>], iteration_bounds = array<i64: 1>, scalar_prefetch = 0 : i64, scratch_operands = 1 : i64, tpu.core_type = #tpu.core_type<tc>, window_params = [{pipeline_mode = #tpu.pipeline_mode<synchronous>, transform_indices = @transform_0, window_bounds = array<i64: 16, 16>}, {pipeline_mode = #tpu.pipeline_mode<synchronous>, transform_indices = @transform_1, window_bounds = array<i64: 16, 32>}, {pipeline_mode = #tpu.pipeline_mode<synchronous>, transform_indices = @transform_2, window_bounds = array<i64: 32, 32>}, {pipeline_mode = #tpu.pipeline_mode<synchronous>, transform_indices = @transform_3, window_bounds = array<i64: 1, 32>}, {pipeline_mode = #tpu.pipeline_mode<synchronous>, transform_indices = @transform_4, window_bounds = array<i64: 32, 32>}, {pipeline_mode = #tpu.pipeline_mode<synchronous>, transform_indices = @transform_5, window_bounds = array<i64: 1, 32>}, {pipeline_mode = #tpu.pipeline_mode<synchronous>, transform_indices = @transform_6, window_bounds = array<i64: 32, 128>}, {pipeline_mode = #tpu.pipeline_mode<synchronous>, transform_indices = @transform_7, window_bounds = array<i64: 1, 128>}, {pipeline_mode = #tpu.pipeline_mode<synchronous>, transform_indices = @transform_8, window_bounds = array<i64: 16, 128>}]} {
    %c0 = arith.constant 0 : index
    %c0_0 = arith.constant 0 : index
    %0 = vector.load %arg1[%c0, %c0_0] : memref<16x16xf32, #tpu.memory_space<vmem>>, vector<16x16xf32>
    %c0_1 = arith.constant 0 : index
    %c0_2 = arith.constant 0 : index
    %1 = vector.load %arg2[%c0_1, %c0_2] : memref<16x32xf32, #tpu.memory_space<vmem>>, vector<16x32xf32>
    %cst = arith.constant dense<0.000000e+00> : vector<16x32xf32>
    %2 = tpu.matmul %0, %1, %cst {dimension_numbers = #tpu.dot_dimension_numbers<[1], [0], [0], [1], [0, 0, 1, 1], [], []>} : vector<16x16xf32>, vector<16x32xf32>, vector<16x32xf32> -> vector<16x32xf32>
    %c0_3 = arith.constant 0 : index
    %c0_4 = arith.constant 0 : index
    %3 = vector.load %arg4[%c0_3, %c0_4] : memref<1x32xf32, #tpu.memory_space<vmem>>, vector<1x32xf32>
    %4 = vector.broadcast %3 : vector<1x32xf32> to vector<16x32xf32>
    %5 = arith.addf %2, %4 : vector<16x32xf32>
    %c0_5 = arith.constant 0 : index
    %c0_6 = arith.constant 0 : index
    %6 = vector.load %arg10[%c0_5, %c0_6] : memref<16x32xf32, #tpu.memory_space<vmem>>, vector<16x32xf32>
    tpu.vector_store %arg10[%c0_5, %c0_6], %5 {strides = array<i32>} : memref<16x32xf32, #tpu.memory_space<vmem>>, vector<16x32xf32>,
    %c0_7 = arith.constant 0 : index
    %c0_8 = arith.constant 0 : index
    %7 = vector.load %arg3[%c0_7, %c0_8] : memref<32x32xf32, #tpu.memory_space<vmem>>, vector<32x32xf32>
    %c0_9 = arith.constant 0 : index
    %c0_10 = arith.constant 0 : index
    %8 = vector.load %arg5[%c0_9, %c0_10] : memref<32x32xf32, #tpu.memory_space<vmem>>, vector<32x32xf32>
    %c0_11 = arith.constant 0 : index
    %c0_12 = arith.constant 0 : index
    %9 = vector.load %arg6[%c0_11, %c0_12] : memref<1x32xf32, #tpu.memory_space<vmem>>, vector<1x32xf32>
    %c0_13 = arith.constant 0 : index
    %c0_14 = arith.constant 0 : index
    %10 = vector.load %arg7[%c0_13, %c0_14] : memref<32x128xf32, #tpu.memory_space<vmem>>, vector<32x128xf32>
    %c0_15 = arith.constant 0 : index
    %c0_16 = arith.constant 0 : index
    %11 = vector.load %arg8[%c0_15, %c0_16] : memref<1x128xf32, #tpu.memory_space<vmem>>, vector<1x128xf32>
    %cst_17 = arith.constant 0.000000e+00 : f32
    %12 = vector.broadcast %cst_17 : f32 to vector<2x32xf32>
    %c0_i32 = arith.constant 0 : i32
    %c2_i32 = arith.constant 2 : i32
    %13 = arith.muli %c0_i32, %c2_i32 : i32
    %14 = arith.index_cast %13 : i32 to index
    %c0_18 = arith.constant 0 : index
    %15 = vector.load %arg10[%14, %c0_18] : memref<16x32xf32, #tpu.memory_space<vmem>>, vector<2x32xf32>
    %cst_19 = arith.constant dense<0.000000e+00> : vector<2x32xf32>
    %16 = tpu.matmul %12, %7, %cst_19 {dimension_numbers = #tpu.dot_dimension_numbers<[1], [0], [0], [1], [0, 0, 1, 1], [], []>} : vector<2x32xf32>, vector<32x32xf32>, vector<2x32xf32> -> vector<2x32xf32>
    %17 = arith.addf %15, %16 : vector<2x32xf32>
    %18 = math.tanh %17 : vector<2x32xf32>
    %cst_20 = arith.constant dense<0.000000e+00> : vector<2x32xf32>
    %19 = tpu.matmul %18, %8, %cst_20 {dimension_numbers = #tpu.dot_dimension_numbers<[1], [0], [0], [1], [0, 0, 1, 1], [], []>} : vector<2x32xf32>, vector<32x32xf32>, vector<2x32xf32> -> vector<2x32xf32>
    %20 = vector.broadcast %9 : vector<1x32xf32> to vector<2x32xf32>
    %21 = arith.addf %19, %20 : vector<2x32xf32>
    %cst_21 = arith.constant 0.000000e+00 : f32
    %22 = vector.broadcast %cst_21 : f32 to vector<2x32xf32>
    %23 = arith.maximumf %21, %22 : vector<2x32xf32>
    %cst_22 = arith.constant dense<0.000000e+00> : vector<2x128xf32>
    %24 = tpu.matmul %23, %10, %cst_22 {dimension_numbers = #tpu.dot_dimension_numbers<[1], [0], [0], [1], [0, 0, 1, 1], [], []>} : vector<2x32xf32>, vector<32x128xf32>, vector<2x128xf32> -> vector<2x128xf32>
    %25 = vector.broadcast %11 : vector<1x128xf32> to vector<2x128xf32>
    %26 = arith.addf %24, %25 : vector<2x128xf32>
    %27 = arith.index_cast %13 : i32 to index
    %c0_23 = arith.constant 0 : index
    %28 = vector.load %arg9[%27, %c0_23] : memref<16x128xf32, #tpu.memory_space<vmem>>, vector<2x128xf32>
    tpu.vector_store %arg9[%27, %c0_23], %26 {strides = array<i32>} : memref<16x128xf32, #tpu.memory_space<vmem>>, vector<2x128xf32>,
    %c1_i32 = arith.constant 1 : i32
    %c2_i32_24 = arith.constant 2 : i32
    %29 = arith.muli %c1_i32, %c2_i32_24 : i32
    %30 = arith.index_cast %29 : i32 to index
    %c0_25 = arith.constant 0 : index
    %31 = vector.load %arg10[%30, %c0_25] : memref<16x32xf32, #tpu.memory_space<vmem>>, vector<2x32xf32>
    %cst_26 = arith.constant dense<0.000000e+00> : vector<2x32xf32>
    %32 = tpu.matmul %18, %7, %cst_26 {dimension_numbers = #tpu.dot_dimension_numbers<[1], [0], [0], [1], [0, 0, 1, 1], [], []>} : vector<2x32xf32>, vector<32x32xf32>, vector<2x32xf32> -> vector<2x32xf32>
    %33 = arith.addf %31, %32 : vector<2x32xf32>
    %34 = math.tanh %33 : vector<2x32xf32>
    %cst_27 = arith.constant dense<0.000000e+00> : vector<2x32xf32>
    %35 = tpu.matmul %34, %8, %cst_27 {dimension_numbers = #tpu.dot_dimension_numbers<[1], [0], [0], [1], [0, 0, 1, 1], [], []>} : vector<2x32xf32>, vector<32x32xf32>, vector<2x32xf32> -> vector<2x32xf32>
    %36 = vector.broadcast %9 : vector<1x32xf32> to vector<2x32xf32>
    %37 = arith.addf %35, %36 : vector<2x32xf32>
    %cst_28 = arith.constant 0.000000e+00 : f32
    %38 = vector.broadcast %cst_28 : f32 to vector<2x32xf32>
    %39 = arith.maximumf %37, %38 : vector<2x32xf32>
    %cst_29 = arith.constant dense<0.000000e+00> : vector<2x128xf32>
    %40 = tpu.matmul %39, %10, %cst_29 {dimension_numbers = #tpu.dot_dimension_numbers<[1], [0], [0], [1], [0, 0, 1, 1], [], []>} : vector<2x32xf32>, vector<32x128xf32>, vector<2x128xf32> -> vector<2x128xf32>
    %41 = vector.broadcast %11 : vector<1x128xf32> to vector<2x128xf32>
    %42 = arith.addf %40, %41 : vector<2x128xf32>
    %43 = arith.index_cast %29 : i32 to index
    %c0_30 = arith.constant 0 : index
    %44 = vector.load %arg9[%43, %c0_30] : memref<16x128xf32, #tpu.memory_space<vmem>>, vector<2x128xf32>
    tpu.vector_store %arg9[%43, %c0_30], %42 {strides = array<i32>} : memref<16x128xf32, #tpu.memory_space<vmem>>, vector<2x128xf32>,
    %c2_i32_31 = arith.constant 2 : i32
    %c2_i32_32 = arith.constant 2 : i32
    %45 = arith.muli %c2_i32_31, %c2_i32_32 : i32
    %46 = arith.index_cast %45 : i32 to index
    %c0_33 = arith.constant 0 : index
    %47 = vector.load %arg10[%46, %c0_33] : memref<16x32xf32, #tpu.memory_space<vmem>>, vector<2x32xf32>
    %cst_34 = arith.constant dense<0.000000e+00> : vector<2x32xf32>
    %48 = tpu.matmul %34, %7, %cst_34 {dimension_numbers = #tpu.dot_dimension_numbers<[1], [0], [0], [1], [0, 0, 1, 1], [], []>} : vector<2x32xf32>, vector<32x32xf32>, vector<2x32xf32> -> vector<2x32xf32>
    %49 = arith.addf %47, %48 : vector<2x32xf32>
    %50 = math.tanh %49 : vector<2x32xf32>
    %cst_35 = arith.constant dense<0.000000e+00> : vector<2x32xf32>
    %51 = tpu.matmul %50, %8, %cst_35 {dimension_numbers = #tpu.dot_dimension_numbers<[1], [0], [0], [1], [0, 0, 1, 1], [], []>} : vector<2x32xf32>, vector<32x32xf32>, vector<2x32xf32> -> vector<2x32xf32>
    %52 = vector.broadcast %9 : vector<1x32xf32> to vector<2x32xf32>
    %53 = arith.addf %51, %52 : vector<2x32xf32>
    %cst_36 = arith.constant 0.000000e+00 : f32
    %54 = vector.broadcast %cst_36 : f32 to vector<2x32xf32>
    %55 = arith.maximumf %53, %54 : vector<2x32xf32>
    %cst_37 = arith.constant dense<0.000000e+00> : vector<2x128xf32>
    %56 = tpu.matmul %55, %10, %cst_37 {dimension_numbers = #tpu.dot_dimension_numbers<[1], [0], [0], [1], [0, 0, 1, 1], [], []>} : vector<2x32xf32>, vector<32x128xf32>, vector<2x128xf32> -> vector<2x128xf32>
    %57 = vector.broadcast %11 : vector<1x128xf32> to vector<2x128xf32>
    %58 = arith.addf %56, %57 : vector<2x128xf32>
    %59 = arith.index_cast %45 : i32 to index
    %c0_38 = arith.constant 0 : index
    %60 = vector.load %arg9[%59, %c0_38] : memref<16x128xf32, #tpu.memory_space<vmem>>, vector<2x128xf32>
    tpu.vector_store %arg9[%59, %c0_38], %58 {strides = array<i32>} : memref<16x128xf32, #tpu.memory_space<vmem>>, vector<2x128xf32>,
    %c3_i32 = arith.constant 3 : i32
    %c2_i32_39 = arith.constant 2 : i32
    %61 = arith.muli %c3_i32, %c2_i32_39 : i32
    %62 = arith.index_cast %61 : i32 to index
    %c0_40 = arith.constant 0 : index
    %63 = vector.load %arg10[%62, %c0_40] : memref<16x32xf32, #tpu.memory_space<vmem>>, vector<2x32xf32>
    %cst_41 = arith.constant dense<0.000000e+00> : vector<2x32xf32>
    %64 = tpu.matmul %50, %7, %cst_41 {dimension_numbers = #tpu.dot_dimension_numbers<[1], [0], [0], [1], [0, 0, 1, 1], [], []>} : vector<2x32xf32>, vector<32x32xf32>, vector<2x32xf32> -> vector<2x32xf32>
    %65 = arith.addf %63, %64 : vector<2x32xf32>
    %66 = math.tanh %65 : vector<2x32xf32>
    %cst_42 = arith.constant dense<0.000000e+00> : vector<2x32xf32>
    %67 = tpu.matmul %66, %8, %cst_42 {dimension_numbers = #tpu.dot_dimension_numbers<[1], [0], [0], [1], [0, 0, 1, 1], [], []>} : vector<2x32xf32>, vector<32x32xf32>, vector<2x32xf32> -> vector<2x32xf32>
    %68 = vector.broadcast %9 : vector<1x32xf32> to vector<2x32xf32>
    %69 = arith.addf %67, %68 : vector<2x32xf32>
    %cst_43 = arith.constant 0.000000e+00 : f32
    %70 = vector.broadcast %cst_43 : f32 to vector<2x32xf32>
    %71 = arith.maximumf %69, %70 : vector<2x32xf32>
    %cst_44 = arith.constant dense<0.000000e+00> : vector<2x128xf32>
    %72 = tpu.matmul %71, %10, %cst_44 {dimension_numbers = #tpu.dot_dimension_numbers<[1], [0], [0], [1], [0, 0, 1, 1], [], []>} : vector<2x32xf32>, vector<32x128xf32>, vector<2x128xf32> -> vector<2x128xf32>
    %73 = vector.broadcast %11 : vector<1x128xf32> to vector<2x128xf32>
    %74 = arith.addf %72, %73 : vector<2x128xf32>
    %75 = arith.index_cast %61 : i32 to index
    %c0_45 = arith.constant 0 : index
    %76 = vector.load %arg9[%75, %c0_45] : memref<16x128xf32, #tpu.memory_space<vmem>>, vector<2x128xf32>
    tpu.vector_store %arg9[%75, %c0_45], %74 {strides = array<i32>} : memref<16x128xf32, #tpu.memory_space<vmem>>, vector<2x128xf32>,
    %c4_i32 = arith.constant 4 : i32
    %c2_i32_46 = arith.constant 2 : i32
    %77 = arith.muli %c4_i32, %c2_i32_46 : i32
    %78 = arith.index_cast %77 : i32 to index
    %c0_47 = arith.constant 0 : index
    %79 = vector.load %arg10[%78, %c0_47] : memref<16x32xf32, #tpu.memory_space<vmem>>, vector<2x32xf32>
    %cst_48 = arith.constant dense<0.000000e+00> : vector<2x32xf32>
    %80 = tpu.matmul %66, %7, %cst_48 {dimension_numbers = #tpu.dot_dimension_numbers<[1], [0], [0], [1], [0, 0, 1, 1], [], []>} : vector<2x32xf32>, vector<32x32xf32>, vector<2x32xf32> -> vector<2x32xf32>
    %81 = arith.addf %79, %80 : vector<2x32xf32>
    %82 = math.tanh %81 : vector<2x32xf32>
    %cst_49 = arith.constant dense<0.000000e+00> : vector<2x32xf32>
    %83 = tpu.matmul %82, %8, %cst_49 {dimension_numbers = #tpu.dot_dimension_numbers<[1], [0], [0], [1], [0, 0, 1, 1], [], []>} : vector<2x32xf32>, vector<32x32xf32>, vector<2x32xf32> -> vector<2x32xf32>
    %84 = vector.broadcast %9 : vector<1x32xf32> to vector<2x32xf32>
    %85 = arith.addf %83, %84 : vector<2x32xf32>
    %cst_50 = arith.constant 0.000000e+00 : f32
    %86 = vector.broadcast %cst_50 : f32 to vector<2x32xf32>
    %87 = arith.maximumf %85, %86 : vector<2x32xf32>
    %cst_51 = arith.constant dense<0.000000e+00> : vector<2x128xf32>
    %88 = tpu.matmul %87, %10, %cst_51 {dimension_numbers = #tpu.dot_dimension_numbers<[1], [0], [0], [1], [0, 0, 1, 1], [], []>} : vector<2x32xf32>, vector<32x128xf32>, vector<2x128xf32> -> vector<2x128xf32>
    %89 = vector.broadcast %11 : vector<1x128xf32> to vector<2x128xf32>
    %90 = arith.addf %88, %89 : vector<2x128xf32>
    %91 = arith.index_cast %77 : i32 to index
    %c0_52 = arith.constant 0 : index
    %92 = vector.load %arg9[%91, %c0_52] : memref<16x128xf32, #tpu.memory_space<vmem>>, vector<2x128xf32>
    tpu.vector_store %arg9[%91, %c0_52], %90 {strides = array<i32>} : memref<16x128xf32, #tpu.memory_space<vmem>>, vector<2x128xf32>,
    %c5_i32 = arith.constant 5 : i32
    %c2_i32_53 = arith.constant 2 : i32
    %93 = arith.muli %c5_i32, %c2_i32_53 : i32
    %94 = arith.index_cast %93 : i32 to index
    %c0_54 = arith.constant 0 : index
    %95 = vector.load %arg10[%94, %c0_54] : memref<16x32xf32, #tpu.memory_space<vmem>>, vector<2x32xf32>
    %cst_55 = arith.constant dense<0.000000e+00> : vector<2x32xf32>
    %96 = tpu.matmul %82, %7, %cst_55 {dimension_numbers = #tpu.dot_dimension_numbers<[1], [0], [0], [1], [0, 0, 1, 1], [], []>} : vector<2x32xf32>, vector<32x32xf32>, vector<2x32xf32> -> vector<2x32xf32>
    %97 = arith.addf %95, %96 : vector<2x32xf32>
    %98 = math.tanh %97 : vector<2x32xf32>
    %cst_56 = arith.constant dense<0.000000e+00> : vector<2x32xf32>
    %99 = tpu.matmul %98, %8, %cst_56 {dimension_numbers = #tpu.dot_dimension_numbers<[1], [0], [0], [1], [0, 0, 1, 1], [], []>} : vector<2x32xf32>, vector<32x32xf32>, vector<2x32xf32> -> vector<2x32xf32>
    %100 = vector.broadcast %9 : vector<1x32xf32> to vector<2x32xf32>
    %101 = arith.addf %99, %100 : vector<2x32xf32>
    %cst_57 = arith.constant 0.000000e+00 : f32
    %102 = vector.broadcast %cst_57 : f32 to vector<2x32xf32>
    %103 = arith.maximumf %101, %102 : vector<2x32xf32>
    %cst_58 = arith.constant dense<0.000000e+00> : vector<2x128xf32>
    %104 = tpu.matmul %103, %10, %cst_58 {dimension_numbers = #tpu.dot_dimension_numbers<[1], [0], [0], [1], [0, 0, 1, 1], [], []>} : vector<2x32xf32>, vector<32x128xf32>, vector<2x128xf32> -> vector<2x128xf32>
    %105 = vector.broadcast %11 : vector<1x128xf32> to vector<2x128xf32>
    %106 = arith.addf %104, %105 : vector<2x128xf32>
    %107 = arith.index_cast %93 : i32 to index
    %c0_59 = arith.constant 0 : index
    %108 = vector.load %arg9[%107, %c0_59] : memref<16x128xf32, #tpu.memory_space<vmem>>, vector<2x128xf32>
    tpu.vector_store %arg9[%107, %c0_59], %106 {strides = array<i32>} : memref<16x128xf32, #tpu.memory_space<vmem>>, vector<2x128xf32>,
    %c6_i32 = arith.constant 6 : i32
    %c2_i32_60 = arith.constant 2 : i32
    %109 = arith.muli %c6_i32, %c2_i32_60 : i32
    %110 = arith.index_cast %109 : i32 to index
    %c0_61 = arith.constant 0 : index
    %111 = vector.load %arg10[%110, %c0_61] : memref<16x32xf32, #tpu.memory_space<vmem>>, vector<2x32xf32>
    %cst_62 = arith.constant dense<0.000000e+00> : vector<2x32xf32>
    %112 = tpu.matmul %98, %7, %cst_62 {dimension_numbers = #tpu.dot_dimension_numbers<[1], [0], [0], [1], [0, 0, 1, 1], [], []>} : vector<2x32xf32>, vector<32x32xf32>, vector<2x32xf32> -> vector<2x32xf32>
    %113 = arith.addf %111, %112 : vector<2x32xf32>
    %114 = math.tanh %113 : vector<2x32xf32>
    %cst_63 = arith.constant dense<0.000000e+00> : vector<2x32xf32>
    %115 = tpu.matmul %114, %8, %cst_63 {dimension_numbers = #tpu.dot_dimension_numbers<[1], [0], [0], [1], [0, 0, 1, 1], [], []>} : vector<2x32xf32>, vector<32x32xf32>, vector<2x32xf32> -> vector<2x32xf32>
    %116 = vector.broadcast %9 : vector<1x32xf32> to vector<2x32xf32>
    %117 = arith.addf %115, %116 : vector<2x32xf32>
    %cst_64 = arith.constant 0.000000e+00 : f32
    %118 = vector.broadcast %cst_64 : f32 to vector<2x32xf32>
    %119 = arith.maximumf %117, %118 : vector<2x32xf32>
    %cst_65 = arith.constant dense<0.000000e+00> : vector<2x128xf32>
    %120 = tpu.matmul %119, %10, %cst_65 {dimension_numbers = #tpu.dot_dimension_numbers<[1], [0], [0], [1], [0, 0, 1, 1], [], []>} : vector<2x32xf32>, vector<32x128xf32>, vector<2x128xf32> -> vector<2x128xf32>
    %121 = vector.broadcast %11 : vector<1x128xf32> to vector<2x128xf32>
    %122 = arith.addf %120, %121 : vector<2x128xf32>
    %123 = arith.index_cast %109 : i32 to index
    %c0_66 = arith.constant 0 : index
    %124 = vector.load %arg9[%123, %c0_66] : memref<16x128xf32, #tpu.memory_space<vmem>>, vector<2x128xf32>
    tpu.vector_store %arg9[%123, %c0_66], %122 {strides = array<i32>} : memref<16x128xf32, #tpu.memory_space<vmem>>, vector<2x128xf32>,
    %c7_i32 = arith.constant 7 : i32
    %c2_i32_67 = arith.constant 2 : i32
    %125 = arith.muli %c7_i32, %c2_i32_67 : i32
    %126 = arith.index_cast %125 : i32 to index
    %c0_68 = arith.constant 0 : index
    %127 = vector.load %arg10[%126, %c0_68] : memref<16x32xf32, #tpu.memory_space<vmem>>, vector<2x32xf32>
    %cst_69 = arith.constant dense<0.000000e+00> : vector<2x32xf32>
    %128 = tpu.matmul %114, %7, %cst_69 {dimension_numbers = #tpu.dot_dimension_numbers<[1], [0], [0], [1], [0, 0, 1, 1], [], []>} : vector<2x32xf32>, vector<32x32xf32>, vector<2x32xf32> -> vector<2x32xf32>
    %129 = arith.addf %127, %128 : vector<2x32xf32>
    %130 = math.tanh %129 : vector<2x32xf32>
    %cst_70 = arith.constant dense<0.000000e+00> : vector<2x32xf32>
    %131 = tpu.matmul %130, %8, %cst_70 {dimension_numbers = #tpu.dot_dimension_numbers<[1], [0], [0], [1], [0, 0, 1, 1], [], []>} : vector<2x32xf32>, vector<32x32xf32>, vector<2x32xf32> -> vector<2x32xf32>
    %132 = vector.broadcast %9 : vector<1x32xf32> to vector<2x32xf32>
    %133 = arith.addf %131, %132 : vector<2x32xf32>
    %cst_71 = arith.constant 0.000000e+00 : f32
    %134 = vector.broadcast %cst_71 : f32 to vector<2x32xf32>
    %135 = arith.maximumf %133, %134 : vector<2x32xf32>
    %cst_72 = arith.constant dense<0.000000e+00> : vector<2x128xf32>
    %136 = tpu.matmul %135, %10, %cst_72 {dimension_numbers = #tpu.dot_dimension_numbers<[1], [0], [0], [1], [0, 0, 1, 1], [], []>} : vector<2x32xf32>, vector<32x128xf32>, vector<2x128xf32> -> vector<2x128xf32>
    %137 = vector.broadcast %11 : vector<1x128xf32> to vector<2x128xf32>
    %138 = arith.addf %136, %137 : vector<2x128xf32>
    %139 = arith.index_cast %125 : i32 to index
    %c0_73 = arith.constant 0 : index
    %140 = vector.load %arg9[%139, %c0_73] : memref<16x128xf32, #tpu.memory_space<vmem>>, vector<2x128xf32>
    tpu.vector_store %arg9[%139, %c0_73], %138 {strides = array<i32>} : memref<16x128xf32, #tpu.memory_space<vmem>>, vector<2x128xf32>,
    %c8_i32 = arith.constant 8 : i32
    return
  }
  func.func @transform_0(%arg0: i32) -> (i32, i32) {
    %c0_i32 = arith.constant 0 : i32
    %c0_i32_0 = arith.constant 0 : i32
    %c0_i32_1 = arith.constant 0 : i32
    return %c0_i32, %c0_i32_0 : i32, i32
  }
  func.func @transform_1(%arg0: i32) -> (i32, i32) {
    %c0_i32 = arith.constant 0 : i32
    %c0_i32_0 = arith.constant 0 : i32
    %c0_i32_1 = arith.constant 0 : i32
    return %c0_i32, %c0_i32_0 : i32, i32
  }
  func.func @transform_2(%arg0: i32) -> (i32, i32) {
    %c0_i32 = arith.constant 0 : i32
    %c0_i32_0 = arith.constant 0 : i32
    %c0_i32_1 = arith.constant 0 : i32
    return %c0_i32, %c0_i32_0 : i32, i32
  }
  func.func @transform_3(%arg0: i32) -> (i32, i32) {
    %c0_i32 = arith.constant 0 : i32
    %c0_i32_0 = arith.constant 0 : i32
    %c0_i32_1 = arith.constant 0 : i32
    return %c0_i32, %c0_i32_0 : i32, i32
  }
  func.func @transform_4(%arg0: i32) -> (i32, i32) {
    %c0_i32 = arith.constant 0 : i32
    %c0_i32_0 = arith.constant 0 : i32
    %c0_i32_1 = arith.constant 0 : i32
    return %c0_i32, %c0_i32_0 : i32, i32
  }
  func.func @transform_5(%arg0: i32) -> (i32, i32) {
    %c0_i32 = arith.constant 0 : i32
    %c0_i32_0 = arith.constant 0 : i32
    %c0_i32_1 = arith.constant 0 : i32
    return %c0_i32, %c0_i32_0 : i32, i32
  }
  func.func @transform_6(%arg0: i32) -> (i32, i32) {
    %c0_i32 = arith.constant 0 : i32
    %c0_i32_0 = arith.constant 0 : i32
    %c0_i32_1 = arith.constant 0 : i32
    return %c0_i32, %c0_i32_0 : i32, i32
  }
  func.func @transform_7(%arg0: i32) -> (i32, i32) {
    %c0_i32 = arith.constant 0 : i32
    %c0_i32_0 = arith.constant 0 : i32
    %c0_i32_1 = arith.constant 0 : i32
    return %c0_i32, %c0_i32_0 : i32, i32
  }
  func.func @transform_8(%arg0: i32) -> (i32, i32) {
    %c0_i32 = arith.constant 0 : i32
    %c0_i32_0 = arith.constant 0 : i32
    %c0_i32_1 = arith.constant 0 : i32
    return %c0_i32, %c0_i32_0 : i32, i32
  }
}

</mosaic_0001>

<bundles_post_ra>
// kernel: my_neural_network_forward.1
= control target key start
LH: loop header
LB: loop body
LE: loop exit
PB: predicated region body
PF: predicated region fallthrough
CT: control target
= control target key end

     0   :  { %vm37_vm0 = vcmask 130048   ;;  %v710_v7 = vmov 0.0   ;;  %vm67_vm1 = vcmask 261120   ;;  %s1004_s1 = inlined_call_operand.vmem [shape: f32[16,32], index: 1, kind: input, shape index: {}]   ;;  %s1005_s0 = inlined_call_operand.vmem [shape: f32[16,16], index: 0, kind: input, shape index: {}]   ;;  %s1006_s2 = inlined_call_operand.vmem [shape: f32[32,32], index: 2, kind: input, shape index: {}]   ;;  %s1007_s3 = inlined_call_operand.vmem [shape: f32[1,32], index: 3, kind: input, shape index: {}]   ;;  %s1008_s4 = inlined_call_operand.vmem [shape: f32[32,32], index: 4, kind: input, shape index: {}]   ;;  %s1009_s5 = inlined_call_operand.vmem [shape: f32[1,32], index: 5, kind: input, shape index: {}]   ;;  %s1010_s6 = inlined_call_operand.vmem [shape: f32[32,128], index: 6, kind: input, shape index: {}]   ;;  %s1011_s7 = inlined_call_operand.vmem [shape: f32[1,128], index: 7, kind: input, shape index: {}]   ;;  %s1012_s8 = inlined_call_operand.vmem [shape: f32[16,128], index: 8, kind: output, shape index: {}]  }
   0x1   :  { %v32_v0 = vld [vmem:[%s1004_s1 + $0x8] sm:$0xff]  ;;  %v31_v1 = vld [vmem:[%s1004_s1] sm:$0xff]  ;;  %v768_v3 = vld [vmem:[%s1006_s2 + $0x18] sm:$0xff] }
   0x2   :  { %58 = vmatpush.msra.mxu0 %v32_v0  ;;  %v29_v2 = vld [vmem:[%s1005_s0] sm:$0xff]  ;;  %v773_v4 = vld [vmem:[%s1006_s2 + $0x10] sm:$0xff]  ;;  %100 = vmatpush.msra.mxu1 %v768_v3  ;;  %v779_v5 = vld [vmem:[%s1006_s2 + $0x8] sm:$0xff] }
   0x3   :  { %v786_v6 = vld [vmem:[%s1006_s2] sm:$0xff]  ;;  %v801_v8 = vld [vmem:[%s1008_s4 + $0x18] sm:$0xff]  ;;  %v807_v9 = vld [vmem:[%s1008_s4 + $0x10] sm:$0xff] }
   0x4   :  { %59 = vmatpush.msra.mxu0 %v31_v1  ;;  %101 = vmatpush.msra.mxu1 %v773_v4  ;;  %v813_v10 = vld [vmem:[%s1008_s4 + $0x8] sm:$0xff]  ;;  %v821_v11 = vld [vmem:[%s1008_s4] sm:$0xff]  ;;  %v847_v20 = vld [vmem:[%s1010_s6 + $0x18] sm:$0xff] }
   0x5   :  { %665 = vmatmul.msk.f32.vlgmr.msra.gmra.mxu0 %vm37_vm0, %v29_v2  ;;  %128 = vmatpush.msra.mxu2 %v801_v8  ;;  %v691_v12 = vld [vmem:[%s1007_s3] ss:$0 sm:$0xff]  ;;  %v30_v19 = vld [vmem:[%s1005_s0 + $0x8] sm:$0xff]  ;;  %v854_v21 = vld [vmem:[%s1010_s6 + $0x10] sm:$0xff] }
   0x6   :  { %248 = vmatpush.msrb.mxu0 %v768_v3  ;;  %102 = vmatpush.msra.mxu1 %v779_v5  ;;  %v862_v22 = vld [vmem:[%s1010_s6 + $0x8] sm:$0xff]  ;;  %v870_v23 = vld [vmem:[%s1010_s6] sm:$0xff] }
   0x7   :  { %129 = vmatpush.msra.mxu2 %v807_v9  ;;  %155 = vmatpush.msra.mxu3 %v847_v20  ;;  %v883_v27 = vld [vmem:[%s1009_s5] ss:$0 sm:$0xff] }
   0x8   :  { %249 = vmatpush.msrb.mxu0 %v773_v4  ;;  %103 = vmatpush.msra.mxu1 %v786_v6  ;;  %v905_v37 = vld [vmem:[%s1011_s7] ss:$0 sm:$0xff] }
   0x9   :  { %104 = vmatmul.f32.vlgmr.msra.gmra.mxu1 %v710_v7  ;;  %130 = vmatpush.msra.mxu2 %v813_v10 }
   0xa   :  { %250 = vmatpush.msrb.mxu0 %v779_v5  ;;  %177 = vmatpush.msrb.mxu1 %v768_v3 }
   0xb   :  { %131 = vmatpush.msra.mxu2 %v821_v11  ;;  %156 = vmatpush.msra.mxu3 %v854_v21 }
   0xc   :  { %251 = vmatpush.msrb.mxu0 %v786_v6  ;;  %178 = vmatpush.msrb.mxu1 %v773_v4 }
   0xd   :  { %202 = vmatpush.msrb.mxu2 %v801_v8  ;;  %666 = vmatmul.msk.f32.gmra.mxu0 %vm37_vm0, %v30_v19 }
   0xe   :  { %179 = vmatpush.msrb.mxu1 %v779_v5  ;;  %344 = vmatpush.msra.mxu0 %v801_v8 }
   0xf   :  { %203 = vmatpush.msrb.mxu2 %v807_v9  ;;  %157 = vmatpush.msra.mxu3 %v862_v22 }
  0x10   :  { %180 = vmatpush.msrb.mxu1 %v786_v6  ;;  %345 = vmatpush.msra.mxu0 %v807_v9 }
  0x11   :  { %204 = vmatpush.msrb.mxu2 %v813_v10  ;;  %158 = vmatpush.msra.mxu3 %v870_v23 }
  0x12   :  { %273 = vmatpush.msra.mxu1 %v801_v8  ;;  %346 = vmatpush.msra.mxu0 %v813_v10 }
  0x13   :  { %205 = vmatpush.msrb.mxu2 %v821_v11  ;;  %226 = vmatpush.msrb.mxu3 %v847_v20 }
  0x14   :  { %274 = vmatpush.msra.mxu1 %v807_v9  ;;  %347 = vmatpush.msra.mxu0 %v821_v11 }
  0x15   :  { %227 = vmatpush.msrb.mxu3 %v854_v21 }
  0x16   :  { %275 = vmatpush.msra.mxu1 %v813_v10 }
  0x17   :  { %228 = vmatpush.msrb.mxu3 %v862_v22 }
  0x18   :  { %276 = vmatpush.msra.mxu1 %v821_v11 }
  0x19   :  { %229 = vmatpush.msrb.mxu3 %v870_v23 }
  0x82   :  { %v61_v13 = vpop.f32.mrf.mxu0 }
  0x83   :  { %v62_v14 = vadd.f32 %v691_v12, %v61_v13 }
  0x85   :  { %68 = vst.msk [vmem:[#allocation2] sm:$0xff] %vm67_vm1, %v62_v14 }
  0x86   :  { %v105_v15 = vpop.f32.mrf.mxu1 }
  0x8a   :  { %v64_v32 = vpop.f32.mrf.mxu0 }
  0x8b   :  { %v65_v33 = vadd.f32 %v691_v12, %v64_v32 }
  0x8c   :  { %v84_v16 = vld [vmem:[#allocation2] sm:$0x3]  ;;  %v164_v24 = vld [vmem:[#allocation2 + $0x2] sm:$0x3]  ;;  %v235_v34 = vld [vmem:[#allocation2 + $0x4] sm:$0x3] }
  0x8d   :  { %v108_v17 = vadd.f32 %v105_v15, %v84_v16  ;;  %69 = vst.msk [vmem:[#allocation2 + $0x8] sm:$0xff] %vm67_vm1, %v65_v33  ;;  %v306_v49 = vld [vmem:[#allocation2 + $0x6] sm:$0x3] }
  0x8f   :  { %694 = vtanh.f32 %v108_v17 }
  0x94   :  { %v377_v58 = vld [vmem:[#allocation2 + $0x8] sm:$0x3]  ;;  %v448_v0 = vld [vmem:[#allocation2 + $0xa] sm:$0x3] }
  0x95   :  { %v695_v18 = vpop.eup %694 }
  0x96   :  { %667 = vmatmul.msk.f32.vlgmr.msra.gmra.mxu2 %vm67_vm1, %v695_v18  ;;  %669 = vmatmul.msk.f32.vlgmr.msrb.gmra.mxu1 %vm67_vm1, %v695_v18 }
  0x97   :  { %297 = vmatpush.msra.mxu2 %v847_v20  ;;  %368 = vmatpush.msrb.mxu1 %v847_v20 }
  0x99   :  { %298 = vmatpush.msra.mxu2 %v854_v21  ;;  %369 = vmatpush.msrb.mxu1 %v854_v21 }
  0x9b   :  { %299 = vmatpush.msra.mxu2 %v862_v22  ;;  %370 = vmatpush.msrb.mxu1 %v862_v22 }
  0x9d   :  { %300 = vmatpush.msra.mxu2 %v870_v23  ;;  %371 = vmatpush.msrb.mxu1 %v870_v23 }
 0x113   :  { %v182_v25 = vpop.f32.mrf.mxu1 }
 0x114   :  { %v185_v26 = vadd.f32 %v182_v25, %v164_v24 }
 0x116   :  { %696 = vtanh.f32 %v185_v26 }
 0x119   :  { %v133_v28 = vpop.f32.mrf.mxu2 }
 0x11a   :  { %v134_v29 = vadd.f32 %v883_v27, %v133_v28 }
 0x11c   :  { %v697_v30 = vpop.eup %696  ;;  %v136_v31 = vmax.f32 %v134_v29, 0.0 }
 0x11d   :  { %670 = vmatmul.msk.f32.vlgmr.msrb.gmra.mxu2 %vm67_vm1, %v697_v30  ;;  %672 = vmatmul.msk.f32.vlgmr.msrb.gmra.mxu0 %vm67_vm1, %v697_v30 }
 0x11e   :  { %668 = vmatmul.msk.f32.vlgmr.msra.gmra.mxu3 %vm67_vm1, %v136_v31  ;;  %390 = vmatpush.msrb.mxu2 %v768_v3 }
 0x11f   :  { %319 = vmatpush.msra.mxu3 %v768_v3  ;;  %439 = vmatpush.msrb.mxu0 %v847_v20 }
 0x120   :  { %391 = vmatpush.msrb.mxu2 %v773_v4 }
 0x121   :  { %320 = vmatpush.msra.mxu3 %v773_v4  ;;  %440 = vmatpush.msrb.mxu0 %v854_v21 }
 0x122   :  { %392 = vmatpush.msrb.mxu2 %v779_v5 }
 0x123   :  { %321 = vmatpush.msra.mxu3 %v779_v5  ;;  %441 = vmatpush.msrb.mxu0 %v862_v22 }
 0x124   :  { %393 = vmatpush.msrb.mxu2 %v786_v6 }
 0x125   :  { %322 = vmatpush.msra.mxu3 %v786_v6  ;;  %442 = vmatpush.msrb.mxu0 %v870_v23 }
 0x19a   :  { %v253_v35 = vpop.f32.mrf.mxu0 }
 0x19b   :  { %v256_v36 = vadd.f32 %v253_v35, %v235_v34 }
 0x19d   :  { %698 = vtanh.f32 %v256_v36 }
 0x1a0   :  { %v207_v38 = vpop.f32.mrf.mxu2 }
 0x1a1   :  { %v208_v39 = vadd.f32 %v883_v27, %v207_v38  ;;  %v160_v40 = vpop.f32.mrf.mxu3 }
 0x1a2   :  { %v161_v41 = vadd.f32 %v905_v37, %v160_v40 }
 0x1a3   :  { %v699_v42 = vpop.eup %698  ;;  %v210_v43 = vmax.f32 %v208_v39, 0.0 }
 0x1a4   :  { %163 = vst [vmem:[%s1012_s8] sm:$0x3] %v161_v41  ;;  %673 = vmatmul.msk.f32.vlgmr.msra.gmra.mxu1 %vm67_vm1, %v699_v42 }
 0x1a5   :  { %671 = vmatmul.msk.f32.vlgmr.msrb.gmra.mxu3 %vm67_vm1, %v210_v43  ;;  %461 = vmatpush.msra.mxu1 %v768_v3 }
 0x1a6   :  { %415 = vmatpush.msrb.mxu3 %v801_v8 }
 0x1a7   :  { %462 = vmatpush.msra.mxu1 %v773_v4 }
 0x1a8   :  { %416 = vmatpush.msrb.mxu3 %v807_v9 }
 0x1a9   :  { %463 = vmatpush.msra.mxu1 %v779_v5 }
 0x1aa   :  { %417 = vmatpush.msrb.mxu3 %v813_v10 }
 0x1ab   :  { %464 = vmatpush.msra.mxu1 %v786_v6 }
 0x1ac   :  { %418 = vmatpush.msrb.mxu3 %v821_v11 }
 0x1ad   :  { %675 = vmatmul.msk.f32.vlgmr.msra.gmra.mxu3 %vm67_vm1, %v699_v42 }
 0x1ae   :  { %510 = vmatpush.msra.mxu3 %v847_v20 }
 0x1b0   :  { %511 = vmatpush.msra.mxu3 %v854_v21 }
 0x1b2   :  { %512 = vmatpush.msra.mxu3 %v862_v22 }
 0x1b4   :  { %513 = vmatpush.msra.mxu3 %v870_v23 }
 0x221   :  { %v278_v44 = vpop.f32.mrf.mxu1 }
 0x222   :  { %v279_v45 = vadd.f32 %v883_v27, %v278_v44 }
 0x224   :  { %v281_v46 = vmax.f32 %v279_v45, 0.0 }
 0x226   :  { %674 = vmatmul.msk.f32.vlgmr.msra.gmra.mxu2 %vm67_vm1, %v281_v46 }
 0x227   :  { %486 = vmatpush.msra.mxu2 %v801_v8 }
 0x228   :  { %v231_v47 = vpop.f32.mrf.mxu3 }
 0x229   :  { %v232_v48 = vadd.f32 %v905_v37, %v231_v47  ;;  %487 = vmatpush.msra.mxu2 %v807_v9 }
 0x22b   :  { %234 = vst [vmem:[%s1012_s8 + $0x2] sm:$0x3] %v232_v48  ;;  %488 = vmatpush.msra.mxu2 %v813_v10 }
 0x22d   :  { %489 = vmatpush.msra.mxu2 %v821_v11 }
 0x230   :  { %v324_v50 = vpop.f32.mrf.mxu3 }
 0x231   :  { %v327_v51 = vadd.f32 %v324_v50, %v306_v49 }
 0x233   :  { %700 = vtanh.f32 %v327_v51 }
 0x239   :  { %v701_v52 = vpop.eup %700 }
 0x23a   :  { %676 = vmatmul.msk.f32.vlgmr.msra.gmra.mxu0 %vm67_vm1, %v701_v52  ;;  %678 = vmatmul.msk.f32.vlgmr.msrb.gmra.mxu2 %vm67_vm1, %v701_v52 }
 0x23b   :  { %532 = vmatpush.msra.mxu0 %v768_v3  ;;  %581 = vmatpush.msrb.mxu2 %v847_v20 }
 0x23d   :  { %533 = vmatpush.msra.mxu0 %v773_v4  ;;  %582 = vmatpush.msrb.mxu2 %v854_v21 }
 0x23f   :  { %534 = vmatpush.msra.mxu0 %v779_v5  ;;  %583 = vmatpush.msrb.mxu2 %v862_v22 }
 0x241   :  { %535 = vmatpush.msra.mxu0 %v786_v6  ;;  %584 = vmatpush.msrb.mxu2 %v870_v23 }
 0x2a9   :  { %v302_v53 = vpop.f32.mrf.mxu2 }
 0x2aa   :  { %v303_v54 = vadd.f32 %v905_v37, %v302_v53 }
 0x2ac   :  { %305 = vst [vmem:[%s1012_s8 + $0x4] sm:$0x3] %v303_v54 }
 0x2b7   :  { %v349_v55 = vpop.f32.mrf.mxu0 }
 0x2b8   :  { %v350_v56 = vadd.f32 %v883_v27, %v349_v55 }
 0x2ba   :  { %v352_v57 = vmax.f32 %v350_v56, 0.0 }
 0x2bc   :  { %677 = vmatmul.msk.f32.vlgmr.msrb.gmra.mxu1 %vm67_vm1, %v352_v57 }
 0x2bd   :  { %v395_v59 = vpop.f32.mrf.mxu2  ;;  %557 = vmatpush.msrb.mxu1 %v801_v8 }
 0x2be   :  { %v398_v60 = vadd.f32 %v395_v59, %v377_v58 }
 0x2bf   :  { %558 = vmatpush.msrb.mxu1 %v807_v9 }
 0x2c0   :  { %702 = vtanh.f32 %v398_v60 }
 0x2c1   :  { %559 = vmatpush.msrb.mxu1 %v813_v10 }
 0x2c3   :  { %560 = vmatpush.msrb.mxu1 %v821_v11 }
 0x2c6   :  { %v703_v61 = vpop.eup %702 }
 0x2c7   :  { %679 = vmatmul.msk.f32.vlgmr.msrb.gmra.mxu3 %vm67_vm1, %v703_v61  ;;  %681 = vmatmul.msk.f32.vlgmr.msra.gmra.mxu1 %vm67_vm1, %v703_v61 }
 0x2c8   :  { %603 = vmatpush.msrb.mxu3 %v768_v3  ;;  %652 = vmatpush.msra.mxu1 %v847_v20 }
 0x2ca   :  { %604 = vmatpush.msrb.mxu3 %v773_v4  ;;  %653 = vmatpush.msra.mxu1 %v854_v21  ;;  %v590_v21 = vld [vmem:[#allocation2 + $0xe] sm:$0x3] }
 0x2cc   :  { %605 = vmatpush.msrb.mxu3 %v779_v5  ;;  %654 = vmatpush.msra.mxu1 %v862_v22 }
 0x2ce   :  { %606 = vmatpush.msrb.mxu3 %v786_v6  ;;  %655 = vmatpush.msra.mxu1 %v870_v23 }
 0x339   :  { %v373_v62 = vpop.f32.mrf.mxu1 }
 0x33a   :  { %v374_v63 = vadd.f32 %v905_v37, %v373_v62 }
 0x33c   :  { %376 = vst [vmem:[%s1012_s8 + $0x6] sm:$0x3] %v374_v63 }
 0x344   :  { %v466_v1 = vpop.f32.mrf.mxu1 }
 0x345   :  { %v469_v2 = vadd.f32 %v466_v1, %v448_v0 }
 0x347   :  { %704 = vtanh.f32 %v469_v2 }
 0x34a   :  { %v420_v3 = vpop.f32.mrf.mxu3 }
 0x34b   :  { %v421_v4 = vadd.f32 %v883_v27, %v420_v3 }
 0x34d   :  { %v705_v5 = vpop.eup %704  ;;  %v423_v7 = vmax.f32 %v421_v4, 0.0 }
 0x34e   :  { %682 = vmatmul.msk.f32.vlgmr.msra.gmra.mxu2 %vm67_vm1, %v705_v5 }
 0x34f   :  { %680 = vmatmul.msk.f32.vlgmr.msrb.gmra.mxu0 %vm67_vm1, %v423_v7 }
 0x350   :  { %628 = vmatpush.msrb.mxu0 %v801_v8  ;;  %v519_v8 = vld [vmem:[#allocation2 + $0xc] sm:$0x3] }
 0x352   :  { %629 = vmatpush.msrb.mxu0 %v807_v9 }
 0x354   :  { %630 = vmatpush.msrb.mxu0 %v813_v10 }
 0x356   :  { %631 = vmatpush.msrb.mxu0 %v821_v11 }
 0x357   :  { %684 = vmatmul.msk.f32.vlgmr.msra.gmra.mxu0 %vm67_vm1, %v705_v5 }
 0x3cc   :  { %v444_v6 = vpop.f32.mrf.mxu0 }
 0x3cd   :  { %v445_v12 = vadd.f32 %v905_v37, %v444_v6 }
 0x3cf   :  { %447 = vst [vmem:[%s1012_s8 + $0x8] sm:$0x3] %v445_v12 }
 0x3d1   :  { %v491_v13 = vpop.f32.mrf.mxu2 }
 0x3d2   :  { %v492_v14 = vadd.f32 %v883_v27, %v491_v13 }
 0x3d4   :  { %v494_v15 = vmax.f32 %v492_v14, 0.0  ;;  %v537_v16 = vpop.f32.mrf.mxu0 }
 0x3d5   :  { %v540_v9 = vadd.f32 %v537_v16, %v519_v8 }
 0x3d6   :  { %683 = vmatmul.msk.f32.vlgmr.msra.gmra.mxu3 %vm67_vm1, %v494_v15 }
 0x3d7   :  { %706 = vtanh.f32 %v540_v9 }
 0x3dd   :  { %v707_v10 = vpop.eup %706 }
 0x3de   :  { %685 = vmatmul.msk.f32.vlgmr.msrb.gmra.mxu1 %vm67_vm1, %v707_v10  ;;  %687 = vmatmul.msk.f32.vlgmr.msrb.gmra.mxu3 %vm67_vm1, %v707_v10 }
 0x459   :  { %v515_v11 = vpop.f32.mrf.mxu3 }
 0x45a   :  { %v516_v17 = vadd.f32 %v905_v37, %v515_v11 }
 0x45b   :  { %v562_v18 = vpop.f32.mrf.mxu1 }
 0x45c   :  { %518 = vst [vmem:[%s1012_s8 + $0xa] sm:$0x3] %v516_v17  ;;  %v563_v19 = vadd.f32 %v883_v27, %v562_v18 }
 0x45e   :  { %v565_v20 = vmax.f32 %v563_v19, 0.0 }
 0x460   :  { %686 = vmatmul.msk.f32.vlgmr.msrb.gmra.mxu2 %vm67_vm1, %v565_v20 }
 0x461   :  { %v608_v22 = vpop.f32.mrf.mxu3 }
 0x462   :  { %v611_v23 = vadd.f32 %v608_v22, %v590_v21 }
 0x464   :  { %708 = vtanh.f32 %v611_v23 }
 0x46a   :  { %v709_v24 = vpop.eup %708 }
 0x46b   :  { %688 = vmatmul.msk.f32.vlgmr.msrb.gmra.mxu0 %vm67_vm1, %v709_v24 }
 0x4e3   :  { %v586_v25 = vpop.f32.mrf.mxu2 }
 0x4e4   :  { %v587_v26 = vadd.f32 %v905_v37, %v586_v25 }
 0x4e6   :  { %589 = vst [vmem:[%s1012_s8 + $0xc] sm:$0x3] %v587_v26 }
 0x4e8   :  { %v633_v28 = vpop.f32.mrf.mxu0 }
 0x4e9   :  { %v634_v29 = vadd.f32 %v883_v27, %v633_v28 }
 0x4eb   :  { %v636_v30 = vmax.f32 %v634_v29, 0.0 }
 0x4ed   :  { %689 = vmatmul.msk.f32.vlgmr.msra.gmra.mxu1 %vm67_vm1, %v636_v30 }
 0x56a   :  { %v657_v31 = vpop.f32.mrf.mxu1 }
 0x56b   :  { %v658_v32 = vadd.f32 %v905_v37, %v657_v31 }
 0x56d   :  { %660 = vst [vmem:[%s1012_s8 + $0xe] sm:$0x3] %v658_v32 }

</bundles_post_ra>
